<compile_context>
chip_gen: v7x
topology: tpu7x:2x2x1
jax: 0.10.0
libtpu: 0.0.40
codegen_flags: <defaults>
</compile_context>

<pallas_src>
import math

import jax
import jax.numpy as jnp
from jax.experimental import pallas as pl
from jax.experimental.pallas import tpu as pltpu


_LANE_W = 1024                 # lane-dense last dim (multiple of 128)
_MAX_BLOCK_BYTES = 8 << 20     # ~8 MiB blocks amortize per-grid-step overhead
_MIN_PALLAS_BYTES = 1 << 20    # below this, plain XLA fusion wins


def _make_sigmoid_shift_kernel(shift, out_scale, out_bias):
    shift = float(shift)
    out_scale = float(out_scale)
    out_bias = float(out_bias)

    def kernel(x_ref, o_ref):
        x = x_ref[...].astype(jnp.float32)
        # exp/logistic on the EUP slot; the scale/bias is plain VPU work.
        y = jax.nn.sigmoid(x + shift) * out_scale + out_bias
        o_ref[...] = y.astype(o_ref.dtype)

    return kernel


def sigmoid_shift_scaler(scale, z=None, b=0.001, m=2, force_pallas=False):
    """Pallas implementation of SigmoidShiftScaler.forward(scale, z).

    `z` is accepted for API parity with the PyTorch module but is unused
    (exactly as in the reference forward), so it is never DMA'd.
    """
    del z  # unused by the reference forward

    sigmoid_shift = math.log((1.0 - b) / (m - 1))
    out_scale = m - b
    out_bias = b

    orig_shape = scale.shape
    dtype = scale.dtype
    itemsize = jnp.dtype(dtype).itemsize
    n = int(scale.size)

    if not force_pallas and n * itemsize < _MIN_PALLAS_BYTES:
        # Tiny tensors: pallas_call launch + grid overhead dominates; let XLA fuse.
        return (jax.nn.sigmoid(scale + sigmoid_shift) * out_scale
                + out_bias).astype(dtype)

    lane_w = _LANE_W
    rows = -(-n // lane_w)          # cdiv(n, lane_w)
    padded_n = rows * lane_w

    flat = scale.reshape(-1)
    if padded_n != n:
        # Only the ragged tail (< lane_w elements) is padded; no row round-up.
        flat = jnp.pad(flat, (0, padded_n - n))
    x2d = flat.reshape(rows, lane_w)

    # Row tiling: sublane-packing multiple (8 f32 / 16 bf16 / 32 int8); aim for
    # >= ~4 blocks on medium/large tensors (dual-TC v7x), block capped ~8 MiB.
    sub = max(8, 32 // itemsize)
    max_tile_r = max(sub, (_MAX_BLOCK_BYTES // (lane_w * itemsize)) // sub * sub)
    if rows <= 4 * sub:
        tile_r = rows               # single full block (full-dim, any row count OK)
    else:
        target = -(-rows // 4)                  # cdiv(rows, 4)
        target = -(-target // sub) * sub        # round up to sublane multiple
        tile_r = min(max_tile_r, target)
    n_blocks = -(-rows // tile_r)   # ragged last block handled by Pallas

    block_bytes = tile_r * lane_w * itemsize
    # in + out, double-buffered, plus headroom; <= ~36 MiB (fits v7x 64 MiB VMEM).
    vmem_limit = max(16 << 20, 4 * block_bytes + (4 << 20))

    kernel = _make_sigmoid_shift_kernel(sigmoid_shift, out_scale, out_bias)

    out2d = pl.pallas_call(
        kernel,
        out_shape=jax.ShapeDtypeStruct((rows, lane_w), dtype),
        grid_spec=pltpu.PrefetchScalarGridSpec(
            num_scalar_prefetch=0,
            grid=(n_blocks,),
            in_specs=[pl.BlockSpec((tile_r, lane_w), lambda i: (i, 0))],
            out_specs=pl.BlockSpec((tile_r, lane_w), lambda i: (i, 0)),
        ),
        compiler_params=pltpu.CompilerParams(
            dimension_semantics=("parallel",),
            vmem_limit_bytes=int(vmem_limit),
        ),
        cost_estimate=pl.CostEstimate(
            flops=3 * padded_n,
            transcendentals=padded_n,
            bytes_accessed=2 * padded_n * itemsize,
        ),
    )(x2d)

    if padded_n != n:
        return out2d.reshape(-1)[:n].reshape(orig_shape)
    return out2d.reshape(orig_shape)


if __name__ == "__main__":
    key = jax.random.PRNGKey(0)
    k1, k2 = jax.random.split(key)

    # Small NCHW-style shapes consistent with a conv-feature-map "scale"/"z".
    scale = jax.random.normal(k1, (2, 4, 16, 16), dtype=jnp.float32)
    z = jax.random.normal(k2, (2, 4, 16, 16), dtype=jnp.float32)

    b, m = 0.001, 2  # module defaults

    out = sigmoid_shift_scaler(scale, z, b=b, m=m, force_pallas=True)
    out = jax.block_until_ready(out)

    # Reference check against exact PyTorch semantics.
    shift = math.log((1.0 - b) / (m - 1))
    ref = jax.nn.sigmoid(scale + shift) * (m - b) + b

    assert out.shape == scale.shape and out.dtype == scale.dtype
    assert jnp.allclose(out, ref, rtol=1e-6, atol=1e-6), "mismatch vs reference"

    print("KERNEL_OK")
</pallas_src>

<mosaic_0001>
module attributes {stable_mosaic.version = 11 : i64} {
  func.func @kernel(%arg0: i32, %arg1: memref<2x1024xf32, #tpu.memory_space<vmem>>, %arg2: memref<2x1024xf32, #tpu.memory_space<vmem>>) attributes {dimension_semantics = [#tpu.dimension_semantics<parallel>], iteration_bounds = array<i64: 1>, scalar_prefetch = 0 : i64, scratch_operands = 0 : i64, tpu.core_type = #tpu.core_type<tc>, window_params = [{transform_indices = @transform_0, window_bounds = array<i64: 2, 1024>}, {transform_indices = @transform_1, window_bounds = array<i64: 2, 1024>}]} {
    %c0 = arith.constant 0 : index
    %c0_0 = arith.constant 0 : index
    %0 = vector.load %arg1[%c0, %c0_0] : memref<2x1024xf32, #tpu.memory_space<vmem>>, vector<2x1024xf32>
    %cst = arith.constant -0.00100050028 : f32
    %1 = vector.broadcast %cst : f32 to vector<2x1024xf32>
    %2 = arith.addf %0, %1 : vector<2x1024xf32>
    %3 = arith.negf %2 : vector<2x1024xf32>
    %4 = math.exp %3 : vector<2x1024xf32>
    %cst_1 = arith.constant 1.000000e+00 : f32
    %5 = vector.broadcast %cst_1 : f32 to vector<2x1024xf32>
    %6 = arith.addf %5, %4 : vector<2x1024xf32>
    %7 = arith.divf %5, %6 : vector<2x1024xf32>
    %cst_2 = arith.constant 1.999000e+00 : f32
    %8 = vector.broadcast %cst_2 : f32 to vector<2x1024xf32>
    %9 = arith.mulf %7, %8 : vector<2x1024xf32>
    %cst_3 = arith.constant 1.000000e-03 : f32
    %10 = vector.broadcast %cst_3 : f32 to vector<2x1024xf32>
    %11 = arith.addf %9, %10 : vector<2x1024xf32>
    %c0_4 = arith.constant 0 : index
    %c0_5 = arith.constant 0 : index
    %12 = vector.load %arg2[%c0_4, %c0_5] : memref<2x1024xf32, #tpu.memory_space<vmem>>, vector<2x1024xf32>
    tpu.vector_store %arg2[%c0_4, %c0_5], %11 {strides = array<i32>} : memref<2x1024xf32, #tpu.memory_space<vmem>>, vector<2x1024xf32>,
    return
  }
  func.func @transform_0(%arg0: i32) -> (i32, i32) {
    %c0_i32 = arith.constant 0 : i32
    %c0_i32_0 = arith.constant 0 : i32
    return %arg0, %c0_i32 : i32, i32
  }
  func.func @transform_1(%arg0: i32) -> (i32, i32) {
    %c0_i32 = arith.constant 0 : i32
    %c0_i32_0 = arith.constant 0 : i32
    return %arg0, %c0_i32 : i32, i32
  }
}

</mosaic_0001>

<bundles_post_ra>
// kernel: tpu_custom_call.1
= control target key start
LH: loop header
LB: loop body
LE: loop exit
PB: predicated region body
PF: predicated region fallthrough
CT: control target
= control target key end

     0   :  { %6 = vsyncpa [#allocation3], 0  ;;  %s154_s0 = inlined_call_operand.hbm [shape: f32[2,1024], index: 0, kind: input, shape index: {}]   ;;  %s155_s1 = inlined_call_operand.hbm [shape: f32[2,1024], index: 1, kind: output, shape index: {}]  }
   0x1   :  { %7 = vsyncpa [#allocation4], 0  ;;  %s118_s6 = smov [#allocation2]   ;;  %s70_s10 = scalar_lea.hbm %s154_s0, 256 }
   0x2   :  { %s14_s7 = sshll.u32 %s118_s6, 4  ;;  %p71_p0 = scmp.ne.s32.totalorder %s154_s0, %s70_s10  ;;  %s15_s7 = int_to_ptr.vmem [resolvable:$true] %s14_s7 }
   0x3   :  { %p74_p1 = scmp.lt.u32.totalorder %s70_s10, %s154_s0 }
   0x5   :  { %p76_p2 = pnand %p74_p1, %p71_p0 }
   0x7   :  { %79 = shalt.err (!%p76_p2)
}
   0x8   :  { %s80_s15 = scalar_lea.vmem %s15_s7, 256  ;;  %p85_p4 = scmp.lt.s32.totalorder %s15_s7, %s15_s7 }
   0x9   :  { %p81_p3 = scmp.ne.s32.totalorder %s15_s7, %s80_s15  ;;  %p86_p5 = scmp.lt.s32.totalorder %s80_s15, %s80_s15 }
   0xb   :  { %p87_p6 = por %p86_p5, %p85_p4 }
   0xd   :  { %p88_p7 = pnand %p87_p6, %p81_p3 }
   0xf   :  { %91 = shalt.err (!%p88_p7)
}
  0x10   :  { %17 = dma.hbm_to_vmem [thread:$0]  %s154_s0, 256, %s15_s7, [#allocation3]  }
  0x11   :  { %114 = dma.done.wait [#allocation3], 256  }
  0x12   :  { %115 = vsyncadd [#allocation3], 4294967040  ;;  %v21_v0 = vld [vmem:[#allocation2] sm:$0xff]  ;;  %v22_v1 = vld [vmem:[#allocation2 + $0x8] sm:$0xff]  ;;  %s119_s0 = smov [#allocation5]  }
  0x13   :  { %v23_v2 = vadd.f32 -0.0010005003, %v21_v0  ;;  %v24_v3 = vadd.f32 -0.0010005003, %v22_v1  ;;  %s49_s18 = sshll.u32 %s119_s0, 4  ;;  %s50_s18 = int_to_ptr.vmem [resolvable:$true] %s49_s18 }
  0x14   :  { %s92_s19 = scalar_lea.vmem %s50_s18, 256  ;;  %p97_p9 = scmp.lt.s32.totalorder %s50_s18, %s50_s18 }
  0x15   :  { %v58_v4 = vmul.f32 -1.442695, %v23_v2  ;;  %v59_v5 = vmul.f32 -1.442695, %v24_v3  ;;  %p93_p8 = scmp.ne.s32.totalorder %s50_s18, %s92_s19  ;;  %p98_p10 = scmp.lt.s32.totalorder %s92_s19, %s92_s19 }
  0x17   :  { %62 = vpow2.f32 %v58_v4  ;;  %p99_p11 = por %p98_p10, %p97_p9 }
  0x18   :  { %64 = vpow2.f32 %v59_v5 }
  0x19   :  { %p100_p12 = pnand %p99_p11, %p93_p8 }
  0x21   :  { %v63_v6 = vpop.eup %62 }
  0x22   :  { %v65_v7 = vpop.eup %64  ;;  %v31_v8 = vadd.f32 1.0, %v63_v6 }
  0x23   :  { %v32_v9 = vadd.f32 1.0, %v65_v7 }
  0x24   :  { %66 = vrcp.f32 %v31_v8 }
  0x25   :  { %68 = vrcp.f32 %v32_v9 }
  0x2e   :  { %v67_v10 = vpop.eup %66 }
  0x2f   :  { %v69_v11 = vpop.eup %68  ;;  %v37_v12 = vmul.f32 1.999, %v67_v10 }
  0x30   :  { %v38_v13 = vmul.f32 1.999, %v69_v11 }
  0x31   :  { %v39_v14 = vadd.f32 0.001, %v37_v12 }
  0x32   :  { %v40_v15 = vadd.f32 0.001, %v38_v13 }
  0x33   :  { %41 = vst [vmem:[#allocation5] sm:$0xff] %v39_v14 }
  0x34   :  { %42 = vst [vmem:[#allocation5 + $0x8] sm:$0xff] %v40_v15 }
  0x35   :  { %103 = shalt.err (!%p100_p12)
}
  0x36   :  { %s104_s22 = scalar_lea.hbm %s155_s1, 256 }
  0x37   :  { %p105_p13 = scmp.ne.s32.totalorder %s155_s1, %s104_s22  ;;  %p108_p0 = scmp.lt.u32.totalorder %s104_s22, %s155_s1 }
  0x39   :  { %p110_p1 = pnand %p108_p0, %p105_p13 }
  0x3b   :  { %113 = shalt.err (!%p110_p1)
}
  0x3c   :  { %52 = dma.vmem_to_hbm [thread:$0]  %s50_s18, 256, %s155_s1, [#allocation4]  }
  0x3d   :  { %116 = dma.done.wait [#allocation4], 256  }
  0x3e   :  { %117 = vsyncadd [#allocation4], 4294967040 }
  0x3f   :  { %56 = vsyncpa [#allocation3], 1 }
  0x40   :  { %57 = vsyncpa [#allocation4], 1 }

</bundles_post_ra>
